<compile_context>
chip_gen: v6e
topology: v6e:2x2x1
jax: 0.10.0
libtpu: 0.0.40
codegen_flags: <defaults>
</compile_context>

<pallas_src>
import functools

import jax
import jax.numpy as jnp
from jax.experimental import pallas as pl
from jax.experimental.pallas import tpu as pltpu

EPS = 1e-5               # nn.GroupNorm default eps
_TM_MAX = 8192           # max actor rows per grid step (8192 x 32 f32 = 1 MiB/block)
_MIN_ROWS_PER_TC = 2048  # only split the grid for megacore if each step keeps this many rows


def _round_up(x, m):
    return ((x + m - 1) // m) * m


@functools.lru_cache(maxsize=1)
def _is_multi_tensorcore_chip():
    """True on chips with 2 TensorCores per device (v7x); perf heuristic only."""
    try:
        kind = jax.devices()[0].device_kind.lower()
    except Exception:
        return False
    return ("v7" in kind) or ("7x" in kind)


def _choose_tm(n_rows):
    """Row-tile size.

    1-TC chips (v5e/v6e): one maximal tile (up to _TM_MAX) -- no forced split.
    2-TC chips (v7x): keep an even number of 'parallel' grid steps so both
    TensorCores stay busy, but only when each step still has >= 2048 rows.
    """
    n8 = max(8, _round_up(n_rows, 8))
    if _is_multi_tensorcore_chip() and n8 >= 2 * _MIN_ROWS_PER_TC:
        steps = max(2, pl.cdiv(n8, _TM_MAX))
        if steps % 2:
            steps += 1
        return _round_up(pl.cdiv(n8, steps), 8)
    return min(_TM_MAX, n8)


def _decoder_kernel(x_ref, c_ref,
                    w1_ref, b1_ref, g1_ref, be1_ref,
                    w2_ref, b2_ref, g2_ref, be2_ref,
                    wh_ref, bh_ref, we_ref,
                    out_ref):
    """LinearRes(n_actor->n_actor, GN ng=1) + fused [generator|reconstructor]
    head + per-row center offset, for one tile of actor rows."""
    x = x_ref[...].astype(jnp.float32)

    # ---- linear1 + GroupNorm(num_groups=1, per row) + ReLU ----
    h = jnp.dot(x, w1_ref[...], preferred_element_type=jnp.float32) + b1_ref[...]
    mu = jnp.mean(h, axis=-1, keepdims=True)
    hc = h - mu
    var = jnp.mean(hc * hc, axis=-1, keepdims=True)        # two-pass variance
    h = hc * jax.lax.rsqrt(var + EPS)
    h = jnp.maximum(h * g1_ref[...] + be1_ref[...], 0.0)

    # ---- linear2 + GroupNorm ----
    h = jnp.dot(h, w2_ref[...], preferred_element_type=jnp.float32) + b2_ref[...]
    mu = jnp.mean(h, axis=-1, keepdims=True)
    hc = h - mu
    var = jnp.mean(hc * hc, axis=-1, keepdims=True)
    h = hc * jax.lax.rsqrt(var + EPS) * g2_ref[...] + be2_ref[...]

    # ---- residual + ReLU ----
    hid = jnp.maximum(h + x, 0.0)

    # ---- fused heads [generator | reconstructor] + center-offset add ----
    # c_ref (tm, 8) has [cx, cy, 0...]; we_ref (8, 32) is the 0/1 expansion
    # matrix, so c @ we == per-row [cx, cy, cx, cy, ...] (exact).
    y = (jnp.dot(hid, wh_ref[...], preferred_element_type=jnp.float32)
         + jnp.dot(c_ref[...], we_ref[...], preferred_element_type=jnp.float32)
         + bh_ref[...])
    out_ref[...] = y.astype(out_ref.dtype)


@jax.jit
def _decoder_heads(actors, ctrs, params):
    """Run the fused decoder+heads kernel on every actor row.

    Returns (N, 4*num_preds) f32:
      cols [: 2*num_preds]  generator output + per-row center offsets
      cols [2*num_preds :]  reconstructor output + per-row center offsets
    """
    n, d = actors.shape
    p2 = params["wg"].shape[1]          # 2 * num_preds (per head)
    w = 2 * p2                          # fused head width (generator | reconstructor)

    x = actors.astype(jnp.float32)
    ctrs8 = jnp.pad(ctrs.astype(jnp.float32), ((0, 0), (0, 6)))          # (n, 8)
    wh = jnp.concatenate([params["wg"], params["wr"]], axis=1)           # (d, w)
    bh = jnp.concatenate([params["bg"], params["br"]], axis=1)           # (1, w)
    we = jnp.concatenate(
        [jnp.tile(jnp.eye(2, dtype=jnp.float32), (1, w // 2)),
         jnp.zeros((6, w), jnp.float32)], axis=0)                        # (8, w)

    tm = _choose_tm(n)
    grid = (pl.cdiv(n, tm),)   # partial tail block (if any) is masked by Pallas

    row_x = pl.BlockSpec((tm, d), lambda i: (i, 0))
    row_c = pl.BlockSpec((tm, 8), lambda i: (i, 0))
    row_o = pl.BlockSpec((tm, w), lambda i: (i, 0))
    w_dd = pl.BlockSpec((d, d), lambda i: (0, 0))
    v_d = pl.BlockSpec((1, d), lambda i: (0, 0))
    w_dw = pl.BlockSpec((d, w), lambda i: (0, 0))
    v_w = pl.BlockSpec((1, w), lambda i: (0, 0))
    w_8w = pl.BlockSpec((8, w), lambda i: (0, 0))

    return pl.pallas_call(
        _decoder_kernel,
        out_shape=jax.ShapeDtypeStruct((n, w), jnp.float32),
        grid_spec=pltpu.PrefetchScalarGridSpec(
            num_scalar_prefetch=0,
            grid=grid,
            in_specs=[row_x, row_c,
                      w_dd, v_d, v_d, v_d,
                      w_dd, v_d, v_d, v_d,
                      w_dw, v_w, w_8w],
            out_specs=row_o),
        compiler_params=pltpu.CompilerParams(
            dimension_semantics=("parallel",),
            vmem_limit_bytes=32 * 1024 * 1024),
    )(x, ctrs8,
      params["w1"], params["b1"], params["g1"], params["be1"],
      params["w2"], params["b2"], params["g2"], params["be2"],
      wh, bh, we)


def net_forward(actors, actor_idcs_mod, actor_ctrs_mod, params):
    """JAX glue reproducing Decoder.forward semantics on top of the Pallas kernel."""
    n = actors.shape[0]
    num_preds = params["wg"].shape[1] // 2
    p2 = 2 * num_preds

    # Flat per-row centers: row idcs[j] gets actor_ctrs_mod[i][j].  Rows not
    # referenced by any idcs keep a zero offset and are never read back.
    idcs_all = jnp.concatenate([jnp.asarray(x) for x in actor_idcs_mod])
    ctrs_all = jnp.concatenate([jnp.asarray(c) for c in actor_ctrs_mod], axis=0)
    ctrs_flat = jnp.zeros((n, 2), jnp.float32).at[idcs_all].set(
        ctrs_all.astype(jnp.float32))

    fused = _decoder_heads(actors, ctrs_flat, params)           # (n, 2*p2)

    reg_all = fused[:, :p2].reshape(n, 1, num_preds, 2)         # offsets already added
    rec_all = fused[:, p2:]                                     # (n, p2); ego rows used

    # TODO(synk): the per-batch list packing (variable-length outputs) has no
    # single-kernel equivalent; it stays as JAX indexing glue.
    out = {"reconstruction": [], "reg": []}
    for i, idcs in enumerate(actor_idcs_mod):
        out["reg"].append(reg_all[idcs])                                  # (n_i, 1, P, 2)
        out["reconstruction"].append(rec_all[idcs[0]].reshape(num_preds, 2))  # (P, 2)
    return out


# ---------------- pure-JAX reference (mirrors the PyTorch forward) ----------------
def _group_norm1(x, gamma, beta):
    mu = jnp.mean(x, axis=-1, keepdims=True)
    var = jnp.mean((x - mu) ** 2, axis=-1, keepdims=True)
    return (x - mu) / jnp.sqrt(var + EPS) * gamma + beta


def net_forward_ref(actors, actor_idcs_mod, actor_ctrs_mod, params):
    h = actors @ params["w1"] + params["b1"]
    h = jnp.maximum(_group_norm1(h, params["g1"], params["be1"]), 0.0)
    h = h @ params["w2"] + params["b2"]
    h = _group_norm1(h, params["g2"], params["be2"])
    hid = jnp.maximum(h + actors, 0.0)

    pred = hid @ params["wg"] + params["bg"]
    ego_rows = jnp.stack([idcs[0] for idcs in actor_idcs_mod])
    recon = hid[ego_rows] @ params["wr"] + params["br"]

    N = actors.shape[0]
    num_preds = pred.shape[1] // 2
    reg = pred.reshape(N, 1, num_preds, 2)
    recon = recon.reshape(len(actor_idcs_mod), 1, num_preds, 2)

    out = {"reconstruction": [], "reg": []}
    for i, idcs in enumerate(actor_idcs_mod):
        ctrs = actor_ctrs_mod[i]
        out["reg"].append(reg[idcs] + ctrs[:, None, None, :])
        out["reconstruction"].append(recon[i, 0] + ctrs[0][None, :])
    return out


if __name__ == "__main__":
    # small config consistent with the module
    config = {"n_actor": 32, "num_preds": 8}
    D = config["n_actor"]
    P2 = 2 * config["num_preds"]

    key = jax.random.PRNGKey(0)
    keys = jax.random.split(key, 16)

    # deterministic synthetic parameters (shapes from __init__; not a checkpoint)
    params = {
        "w1": jax.random.normal(keys[0], (D, D), jnp.float32) * 0.1,
        "b1": jax.random.normal(keys[1], (1, D), jnp.float32) * 0.1,
        "g1": 1.0 + jax.random.normal(keys[2], (1, D), jnp.float32) * 0.05,
        "be1": jax.random.normal(keys[3], (1, D), jnp.float32) * 0.05,
        "w2": jax.random.normal(keys[4], (D, D), jnp.float32) * 0.1,
        "b2": jax.random.normal(keys[5], (1, D), jnp.float32) * 0.1,
        "g2": 1.0 + jax.random.normal(keys[6], (1, D), jnp.float32) * 0.05,
        "be2": jax.random.normal(keys[7], (1, D), jnp.float32) * 0.05,
        "wg": jax.random.normal(keys[8], (D, P2), jnp.float32) * 0.1,
        "bg": jax.random.normal(keys[9], (1, P2), jnp.float32) * 0.1,
        "wr": jax.random.normal(keys[10], (D, P2), jnp.float32) * 0.1,
        "br": jax.random.normal(keys[11], (1, P2), jnp.float32) * 0.1,
    }

    # 2 batch elements with 5 and 3 actors -> 8 actor rows total
    actors = jax.random.normal(keys[12], (8, D), jnp.float32)
    actor_idcs_mod = [jnp.arange(0, 5, dtype=jnp.int32),
                      jnp.arange(5, 8, dtype=jnp.int32)]
    actor_ctrs_mod = [jax.random.normal(keys[13], (5, 2), jnp.float32),
                      jax.random.normal(keys[14], (3, 2), jnp.float32)]

    out = net_forward(actors, actor_idcs_mod, actor_ctrs_mod, params)
    jax.block_until_ready(out["reg"][0])
    jax.block_until_ready(out["reconstruction"][0])

    ref = net_forward_ref(actors, actor_idcs_mod, actor_ctrs_mod, params)
    for a, b_ in zip(out["reg"], ref["reg"]):
        assert a.shape == b_.shape, "reg shape mismatch"
        assert jnp.allclose(a, b_, atol=1e-4, rtol=1e-4), "reg mismatch"
    for a, b_ in zip(out["reconstruction"], ref["reconstruction"]):
        assert a.shape == b_.shape, "reconstruction shape mismatch"
        assert jnp.allclose(a, b_, atol=1e-4, rtol=1e-4), "reconstruction mismatch"

    print("KERNEL_OK")
</pallas_src>

<mosaic_0001>
module attributes {stable_mosaic.version = 11 : i64} {
  func.func @_decoder_kernel(%arg0: i32, %arg1: memref<8x32xf32, #tpu.memory_space<vmem>>, %arg2: memref<8x8xf32, #tpu.memory_space<vmem>>, %arg3: memref<32x32xf32, #tpu.memory_space<vmem>>, %arg4: memref<1x32xf32, #tpu.memory_space<vmem>>, %arg5: memref<1x32xf32, #tpu.memory_space<vmem>>, %arg6: memref<1x32xf32, #tpu.memory_space<vmem>>, %arg7: memref<32x32xf32, #tpu.memory_space<vmem>>, %arg8: memref<1x32xf32, #tpu.memory_space<vmem>>, %arg9: memref<1x32xf32, #tpu.memory_space<vmem>>, %arg10: memref<1x32xf32, #tpu.memory_space<vmem>>, %arg11: memref<32x32xf32, #tpu.memory_space<vmem>>, %arg12: memref<1x32xf32, #tpu.memory_space<vmem>>, %arg13: memref<8x32xf32, #tpu.memory_space<vmem>>, %arg14: memref<8x32xf32, #tpu.memory_space<vmem>>) attributes {dimension_semantics = [#tpu.dimension_semantics<parallel>], iteration_bounds = array<i64: 1>, scalar_prefetch = 0 : i64, scratch_operands = 0 : i64, tpu.core_type = #tpu.core_type<tc>, window_params = [{transform_indices = @transform_0, window_bounds = array<i64: 8, 32>}, {transform_indices = @transform_1, window_bounds = array<i64: 8, 8>}, {pipeline_mode = #tpu.pipeline_mode<synchronous>, transform_indices = @transform_2, window_bounds = array<i64: 32, 32>}, {pipeline_mode = #tpu.pipeline_mode<synchronous>, transform_indices = @transform_3, window_bounds = array<i64: 1, 32>}, {pipeline_mode = #tpu.pipeline_mode<synchronous>, transform_indices = @transform_4, window_bounds = array<i64: 1, 32>}, {pipeline_mode = #tpu.pipeline_mode<synchronous>, transform_indices = @transform_5, window_bounds = array<i64: 1, 32>}, {pipeline_mode = #tpu.pipeline_mode<synchronous>, transform_indices = @transform_6, window_bounds = array<i64: 32, 32>}, {pipeline_mode = #tpu.pipeline_mode<synchronous>, transform_indices = @transform_7, window_bounds = array<i64: 1, 32>}, {pipeline_mode = #tpu.pipeline_mode<synchronous>, transform_indices = @transform_8, window_bounds = array<i64: 1, 32>}, {pipeline_mode = #tpu.pipeline_mode<synchronous>, transform_indices = @transform_9, window_bounds = array<i64: 1, 32>}, {pipeline_mode = #tpu.pipeline_mode<synchronous>, transform_indices = @transform_10, window_bounds = array<i64: 32, 32>}, {pipeline_mode = #tpu.pipeline_mode<synchronous>, transform_indices = @transform_11, window_bounds = array<i64: 1, 32>}, {pipeline_mode = #tpu.pipeline_mode<synchronous>, transform_indices = @transform_12, window_bounds = array<i64: 8, 32>}, {transform_indices = @transform_13, window_bounds = array<i64: 8, 32>}]} {
    %c0 = arith.constant 0 : index
    %c0_0 = arith.constant 0 : index
    %0 = vector.load %arg1[%c0, %c0_0] : memref<8x32xf32, #tpu.memory_space<vmem>>, vector<8x32xf32>
    %c0_1 = arith.constant 0 : index
    %c0_2 = arith.constant 0 : index
    %1 = vector.load %arg3[%c0_1, %c0_2] : memref<32x32xf32, #tpu.memory_space<vmem>>, vector<32x32xf32>
    %cst = arith.constant dense<0.000000e+00> : vector<8x32xf32>
    %2 = tpu.matmul %0, %1, %cst {dimension_numbers = #tpu.dot_dimension_numbers<[1], [0], [0], [1], [0, 0, 1, 1], [], []>} : vector<8x32xf32>, vector<32x32xf32>, vector<8x32xf32> -> vector<8x32xf32>
    %c0_3 = arith.constant 0 : index
    %c0_4 = arith.constant 0 : index
    %3 = vector.load %arg4[%c0_3, %c0_4] : memref<1x32xf32, #tpu.memory_space<vmem>>, vector<1x32xf32>
    %4 = vector.broadcast %3 : vector<1x32xf32> to vector<8x32xf32>
    %5 = arith.addf %2, %4 : vector<8x32xf32>
    %cst_5 = arith.constant dense<0.000000e+00> : vector<8xf32>
    %6 = vector.multi_reduction <add>, %5, %cst_5 [1] : vector<8x32xf32> to vector<8xf32>
    %7 = vector.shape_cast %6 : vector<8xf32> to vector<8x1xf32>
    %cst_6 = arith.constant 3.200000e+01 : f32
    %8 = vector.broadcast %cst_6 : f32 to vector<8x1xf32>
    %9 = arith.divf %7, %8 : vector<8x1xf32>
    %10 = vector.broadcast %9 : vector<8x1xf32> to vector<8x32xf32>
    %11 = arith.subf %5, %10 : vector<8x32xf32>
    %12 = arith.mulf %11, %11 : vector<8x32xf32>
    %cst_7 = arith.constant dense<0.000000e+00> : vector<8xf32>
    %13 = vector.multi_reduction <add>, %12, %cst_7 [1] : vector<8x32xf32> to vector<8xf32>
    %14 = vector.shape_cast %13 : vector<8xf32> to vector<8x1xf32>
    %cst_8 = arith.constant 3.200000e+01 : f32
    %15 = vector.broadcast %cst_8 : f32 to vector<8x1xf32>
    %16 = arith.divf %14, %15 : vector<8x1xf32>
    %cst_9 = arith.constant 9.99999974E-6 : f32
    %17 = vector.broadcast %cst_9 : f32 to vector<8x1xf32>
    %18 = arith.addf %16, %17 : vector<8x1xf32>
    %19 = math.rsqrt %18 : vector<8x1xf32>
    %20 = vector.broadcast %19 : vector<8x1xf32> to vector<8x32xf32>
    %21 = arith.mulf %11, %20 : vector<8x32xf32>
    %c0_10 = arith.constant 0 : index
    %c0_11 = arith.constant 0 : index
    %22 = vector.load %arg5[%c0_10, %c0_11] : memref<1x32xf32, #tpu.memory_space<vmem>>, vector<1x32xf32>
    %23 = vector.broadcast %22 : vector<1x32xf32> to vector<8x32xf32>
    %24 = arith.mulf %21, %23 : vector<8x32xf32>
    %c0_12 = arith.constant 0 : index
    %c0_13 = arith.constant 0 : index
    %25 = vector.load %arg6[%c0_12, %c0_13] : memref<1x32xf32, #tpu.memory_space<vmem>>, vector<1x32xf32>
    %26 = vector.broadcast %25 : vector<1x32xf32> to vector<8x32xf32>
    %27 = arith.addf %24, %26 : vector<8x32xf32>
    %cst_14 = arith.constant 0.000000e+00 : f32
    %28 = vector.broadcast %cst_14 : f32 to vector<8x32xf32>
    %29 = arith.maximumf %27, %28 : vector<8x32xf32>
    %c0_15 = arith.constant 0 : index
    %c0_16 = arith.constant 0 : index
    %30 = vector.load %arg7[%c0_15, %c0_16] : memref<32x32xf32, #tpu.memory_space<vmem>>, vector<32x32xf32>
    %cst_17 = arith.constant dense<0.000000e+00> : vector<8x32xf32>
    %31 = tpu.matmul %29, %30, %cst_17 {dimension_numbers = #tpu.dot_dimension_numbers<[1], [0], [0], [1], [0, 0, 1, 1], [], []>} : vector<8x32xf32>, vector<32x32xf32>, vector<8x32xf32> -> vector<8x32xf32>
    %c0_18 = arith.constant 0 : index
    %c0_19 = arith.constant 0 : index
    %32 = vector.load %arg8[%c0_18, %c0_19] : memref<1x32xf32, #tpu.memory_space<vmem>>, vector<1x32xf32>
    %33 = vector.broadcast %32 : vector<1x32xf32> to vector<8x32xf32>
    %34 = arith.addf %31, %33 : vector<8x32xf32>
    %cst_20 = arith.constant dense<0.000000e+00> : vector<8xf32>
    %35 = vector.multi_reduction <add>, %34, %cst_20 [1] : vector<8x32xf32> to vector<8xf32>
    %36 = vector.shape_cast %35 : vector<8xf32> to vector<8x1xf32>
    %cst_21 = arith.constant 3.200000e+01 : f32
    %37 = vector.broadcast %cst_21 : f32 to vector<8x1xf32>
    %38 = arith.divf %36, %37 : vector<8x1xf32>
    %39 = vector.broadcast %38 : vector<8x1xf32> to vector<8x32xf32>
    %40 = arith.subf %34, %39 : vector<8x32xf32>
    %41 = arith.mulf %40, %40 : vector<8x32xf32>
    %cst_22 = arith.constant dense<0.000000e+00> : vector<8xf32>
    %42 = vector.multi_reduction <add>, %41, %cst_22 [1] : vector<8x32xf32> to vector<8xf32>
    %43 = vector.shape_cast %42 : vector<8xf32> to vector<8x1xf32>
    %cst_23 = arith.constant 3.200000e+01 : f32
    %44 = vector.broadcast %cst_23 : f32 to vector<8x1xf32>
    %45 = arith.divf %43, %44 : vector<8x1xf32>
    %cst_24 = arith.constant 9.99999974E-6 : f32
    %46 = vector.broadcast %cst_24 : f32 to vector<8x1xf32>
    %47 = arith.addf %45, %46 : vector<8x1xf32>
    %48 = math.rsqrt %47 : vector<8x1xf32>
    %49 = vector.broadcast %48 : vector<8x1xf32> to vector<8x32xf32>
    %50 = arith.mulf %40, %49 : vector<8x32xf32>
    %c0_25 = arith.constant 0 : index
    %c0_26 = arith.constant 0 : index
    %51 = vector.load %arg9[%c0_25, %c0_26] : memref<1x32xf32, #tpu.memory_space<vmem>>, vector<1x32xf32>
    %52 = vector.broadcast %51 : vector<1x32xf32> to vector<8x32xf32>
    %53 = arith.mulf %50, %52 : vector<8x32xf32>
    %c0_27 = arith.constant 0 : index
    %c0_28 = arith.constant 0 : index
    %54 = vector.load %arg10[%c0_27, %c0_28] : memref<1x32xf32, #tpu.memory_space<vmem>>, vector<1x32xf32>
    %55 = vector.broadcast %54 : vector<1x32xf32> to vector<8x32xf32>
    %56 = arith.addf %53, %55 : vector<8x32xf32>
    %57 = arith.addf %56, %0 : vector<8x32xf32>
    %cst_29 = arith.constant 0.000000e+00 : f32
    %58 = vector.broadcast %cst_29 : f32 to vector<8x32xf32>
    %59 = arith.maximumf %57, %58 : vector<8x32xf32>
    %c0_30 = arith.constant 0 : index
    %c0_31 = arith.constant 0 : index
    %60 = vector.load %arg11[%c0_30, %c0_31] : memref<32x32xf32, #tpu.memory_space<vmem>>, vector<32x32xf32>
    %cst_32 = arith.constant dense<0.000000e+00> : vector<8x32xf32>
    %61 = tpu.matmul %59, %60, %cst_32 {dimension_numbers = #tpu.dot_dimension_numbers<[1], [0], [0], [1], [0, 0, 1, 1], [], []>} : vector<8x32xf32>, vector<32x32xf32>, vector<8x32xf32> -> vector<8x32xf32>
    %c0_33 = arith.constant 0 : index
    %c0_34 = arith.constant 0 : index
    %62 = vector.load %arg2[%c0_33, %c0_34] : memref<8x8xf32, #tpu.memory_space<vmem>>, vector<8x8xf32>
    %c0_35 = arith.constant 0 : index
    %c0_36 = arith.constant 0 : index
    %63 = vector.load %arg13[%c0_35, %c0_36] : memref<8x32xf32, #tpu.memory_space<vmem>>, vector<8x32xf32>
    %cst_37 = arith.constant dense<0.000000e+00> : vector<8x32xf32>
    %64 = tpu.matmul %62, %63, %cst_37 {dimension_numbers = #tpu.dot_dimension_numbers<[1], [0], [0], [1], [0, 0, 1, 1], [], []>} : vector<8x8xf32>, vector<8x32xf32>, vector<8x32xf32> -> vector<8x32xf32>
    %65 = arith.addf %61, %64 : vector<8x32xf32>
    %c0_38 = arith.constant 0 : index
    %c0_39 = arith.constant 0 : index
    %66 = vector.load %arg12[%c0_38, %c0_39] : memref<1x32xf32, #tpu.memory_space<vmem>>, vector<1x32xf32>
    %67 = vector.broadcast %66 : vector<1x32xf32> to vector<8x32xf32>
    %68 = arith.addf %65, %67 : vector<8x32xf32>
    %c0_40 = arith.constant 0 : index
    %c0_41 = arith.constant 0 : index
    %69 = vector.load %arg14[%c0_40, %c0_41] : memref<8x32xf32, #tpu.memory_space<vmem>>, vector<8x32xf32>
    tpu.vector_store %arg14[%c0_40, %c0_41], %68 {strides = array<i32>} : memref<8x32xf32, #tpu.memory_space<vmem>>, vector<8x32xf32>,
    return
  }
  func.func @transform_0(%arg0: i32) -> (i32, i32) {
    %c0_i32 = arith.constant 0 : i32
    %c0_i32_0 = arith.constant 0 : i32
    return %arg0, %c0_i32 : i32, i32
  }
  func.func @transform_1(%arg0: i32) -> (i32, i32) {
    %c0_i32 = arith.constant 0 : i32
    %c0_i32_0 = arith.constant 0 : i32
    return %arg0, %c0_i32 : i32, i32
  }
  func.func @transform_2(%arg0: i32) -> (i32, i32) {
    %c0_i32 = arith.constant 0 : i32
    %c0_i32_0 = arith.constant 0 : i32
    %c0_i32_1 = arith.constant 0 : i32
    return %c0_i32, %c0_i32_0 : i32, i32
  }
  func.func @transform_3(%arg0: i32) -> (i32, i32) {
    %c0_i32 = arith.constant 0 : i32
    %c0_i32_0 = arith.constant 0 : i32
    %c0_i32_1 = arith.constant 0 : i32
    return %c0_i32, %c0_i32_0 : i32, i32
  }
  func.func @transform_4(%arg0: i32) -> (i32, i32) {
    %c0_i32 = arith.constant 0 : i32
    %c0_i32_0 = arith.constant 0 : i32
    %c0_i32_1 = arith.constant 0 : i32
    return %c0_i32, %c0_i32_0 : i32, i32
  }
  func.func @transform_5(%arg0: i32) -> (i32, i32) {
    %c0_i32 = arith.constant 0 : i32
    %c0_i32_0 = arith.constant 0 : i32
    %c0_i32_1 = arith.constant 0 : i32
    return %c0_i32, %c0_i32_0 : i32, i32
  }
  func.func @transform_6(%arg0: i32) -> (i32, i32) {
    %c0_i32 = arith.constant 0 : i32
    %c0_i32_0 = arith.constant 0 : i32
    %c0_i32_1 = arith.constant 0 : i32
    return %c0_i32, %c0_i32_0 : i32, i32
  }
  func.func @transform_7(%arg0: i32) -> (i32, i32) {
    %c0_i32 = arith.constant 0 : i32
    %c0_i32_0 = arith.constant 0 : i32
    %c0_i32_1 = arith.constant 0 : i32
    return %c0_i32, %c0_i32_0 : i32, i32
  }
  func.func @transform_8(%arg0: i32) -> (i32, i32) {
    %c0_i32 = arith.constant 0 : i32
    %c0_i32_0 = arith.constant 0 : i32
    %c0_i32_1 = arith.constant 0 : i32
    return %c0_i32, %c0_i32_0 : i32, i32
  }
  func.func @transform_9(%arg0: i32) -> (i32, i32) {
    %c0_i32 = arith.constant 0 : i32
    %c0_i32_0 = arith.constant 0 : i32
    %c0_i32_1 = arith.constant 0 : i32
    return %c0_i32, %c0_i32_0 : i32, i32
  }
  func.func @transform_10(%arg0: i32) -> (i32, i32) {
    %c0_i32 = arith.constant 0 : i32
    %c0_i32_0 = arith.constant 0 : i32
    %c0_i32_1 = arith.constant 0 : i32
    return %c0_i32, %c0_i32_0 : i32, i32
  }
  func.func @transform_11(%arg0: i32) -> (i32, i32) {
    %c0_i32 = arith.constant 0 : i32
    %c0_i32_0 = arith.constant 0 : i32
    %c0_i32_1 = arith.constant 0 : i32
    return %c0_i32, %c0_i32_0 : i32, i32
  }
  func.func @transform_12(%arg0: i32) -> (i32, i32) {
    %c0_i32 = arith.constant 0 : i32
    %c0_i32_0 = arith.constant 0 : i32
    %c0_i32_1 = arith.constant 0 : i32
    return %c0_i32, %c0_i32_0 : i32, i32
  }
  func.func @transform_13(%arg0: i32) -> (i32, i32) {
    %c0_i32 = arith.constant 0 : i32
    %c0_i32_0 = arith.constant 0 : i32
    return %arg0, %c0_i32 : i32, i32
  }
}

</mosaic_0001>

<bundles_post_ra>
// kernel: tile.9
= control target key start
LH: loop header
LB: loop body
LE: loop exit
PB: predicated region body
PF: predicated region fallthrough
CT: control target
= control target key end

     0   :  { %s7_s6 = smov 3  ;;  %s21_s9 = smov 3  ;;  %vm4_vm0 = vcmask 15360   ;;  %vm11_vm1 = vcmask 261360   ;;  %vm18_vm2 = vcmask 244960   ;;  %vm25_vm3 = vcmask 228560   ;;  %s225_s0 = inlined_call_operand.vmem [shape: f32[2,16,2], index: 0, kind: input, shape index: {}]   ;;  %s226_s1 = inlined_call_operand.vmem [shape: f32[2,32], index: 1, kind: output, shape index: {}]  }
   0x1   :  { %v119_v0 = vld [vmem:[%s225_s0 + $0xf] ss:$16 sm:%s7_s6]   ;;  %s149_s10 = smov 30   ;;  %v121_v1 = vld [vmem:[%s225_s0 + $0xd] ss:$16 sm:%s21_s9]   ;;  %s14_s13 = smov 3 }
   0x2   :  { %9 = vrot.lane.b32.xlu0 %v119_v0, %s149_s10  ;;  %s150_s14 = smov 26   ;;  %v120_v2 = vld [vmem:[%s225_s0 + $0xe] ss:$16 sm:%s14_s13]   ;;  %s28_s17 = smov 3  ;;  %vm32_vm4 = vcmask 212160   ;;  %vm39_vm5 = vcmask 195760  }
   0x3   :  { %23 = vrot.lane.b32.xlu1 %v121_v1, %s150_s14  ;;  %v122_v3 = vld [vmem:[%s225_s0 + $0xc] ss:$16 sm:%s28_s17]   ;;  %s35_s20 = smov 3  ;;  %s42_s21 = smov 3  ;;  %vm46_vm6 = vcmask 179360   ;;  %vm53_vm7 = vcmask 162960  }
   0x4   :  { %s151_s22 = smov 28   ;;  %s152_s23 = smov 24   ;;  %v123_v4 = vld [vmem:[%s225_s0 + $0xb] ss:$16 sm:%s35_s20]   ;;  %v124_v5 = vld [vmem:[%s225_s0 + $0xa] ss:$16 sm:%s42_s21]  }
   0x5   :  { %s49_s28 = smov 3  ;;  %s56_s29 = smov 3  ;;  %vm60_vm8 = vcmask 146560   ;;  %vm67_vm9 = vcmask 130160   ;;  %vm74_vm10 = vcmask 113760   ;;  %vm81_vm11 = vcmask 97360  }
   0x6   :  { %16 = vrot.lane.b32.xlu0 %v120_v2, %s151_s22  ;;  %s153_s30 = smov 22   ;;  %s154_s2 = smov 20   ;;  %v125_v6 = vld [vmem:[%s225_s0 + $0x9] ss:$16 sm:%s49_s28]   ;;  %vm88_vm12 = vcmask 80960   ;;  %vm95_vm13 = vcmask 64560  }
   0x7   :  { %30 = vrot.lane.b32.xlu1 %v122_v3, %s152_s23  ;;  %v126_v7 = vld [vmem:[%s225_s0 + $0x8] ss:$16 sm:%s56_s29]   ;;  %s63_s7 = smov 3  ;;  %s70_s8 = smov 3  ;;  %vm102_vm14 = vcmask 48160   ;;  %vm109_vm15 = vcmask 31760  }
   0x8   :  { %s155_s9 = smov 18   ;;  %s156_s10 = smov 16   ;;  %v127_v8 = vld [vmem:[%s225_s0 + $0x7] ss:$16 sm:%s63_s7]   ;;  %v128_v9 = vld [vmem:[%s225_s0 + $0x6] ss:$16 sm:%s70_s8]  }
   0x9   :  { %s2_s13 = smov 3  ;;  %s77_s16 = smov 3 }
   0xa   :  { %37 = vrot.lane.b32.xlu0 %v123_v4, %s153_s30  ;;  %v3_v10 = vld [vmem:[%s225_s0] ss:$16 sm:%s2_s13]   ;;  %s84_s19 = smov 3  ;;  %s157_s20 = smov 14  }
   0xb   :  { %44 = vrot.lane.b32.xlu1 %v124_v5, %s154_s2  ;;  %5 = vst.msk [vmem:[#allocation0] sm:$0x3] %vm4_vm0, %v3_v10   ;;  %s158_s21 = smov 12   ;;  %v129_v11 = vld [vmem:[%s225_s0 + $0x5] ss:$16 sm:%s77_s16]   ;;  %s91_s26 = smov 3 }
   0xc   :  { %v130_v12 = vld [vmem:[%s225_s0 + $0x4] ss:$16 sm:%s84_s19]   ;;  %s98_s27 = smov 3  ;;  %s159_s28 = smov 10   ;;  %v131_v13 = vld [vmem:[%s225_s0 + $0x3] ss:$16 sm:%s91_s26]  }
   0xd   :  { %s160_s29 = smov 8   ;;  %v132_v14 = vld [vmem:[%s225_s0 + $0x2] ss:$16 sm:%s98_s27]   ;;  %s105_s5 = smov 3 }
   0xe   :  { %51 = vrot.lane.b32.xlu0 %v125_v6, %s155_s9  ;;  %s161_s6 = smov 6   ;;  %s162_s7 = smov 4   ;;  %v133_v15 = vld [vmem:[%s225_s0 + $0x1] ss:$16 sm:%s105_s5]  }
   0xf   :  { %58 = vrot.lane.b32.xlu1 %v126_v7, %s156_s10  ;;  %s163_s0 = smov 2  }
  0x12   :  { %65 = vrot.lane.b32.xlu0 %v127_v8, %s157_s20 }
  0x13   :  { %72 = vrot.lane.b32.xlu1 %v128_v9, %s158_s21 }
  0x16   :  { %79 = vrot.lane.b32.xlu0 %v129_v11, %s159_s28 }
  0x17   :  { %86 = vrot.lane.b32.xlu1 %v130_v12, %s160_s29 }
  0x1a   :  { %93 = vrot.lane.b32.xlu0 %v131_v13, %s161_s6 }
  0x1b   :  { %100 = vrot.lane.b32.xlu1 %v132_v14, %s162_s7 }
  0x1e   :  { %107 = vrot.lane.b32.xlu0 %v133_v15, %s163_s0 }
  0x74   :  { %v10_v16 = vpop.permute.xlu0 %9  }
  0x75   :  { %12 = vst.msk [vmem:[#allocation0] sm:$0x3] %vm11_vm1, %v10_v16   ;;  %v24_v17 = vpop.permute.xlu1 %23  }
  0x78   :  { %v17_v18 = vpop.permute.xlu0 %16  }
  0x79   :  { %19 = vst.msk [vmem:[#allocation0] sm:$0x3] %vm18_vm2, %v17_v18   ;;  %v31_v19 = vpop.permute.xlu1 %30  }
  0x7a   :  { %26 = vst.msk [vmem:[#allocation0] sm:$0x3] %vm25_vm3, %v24_v17  }
  0x7b   :  { %33 = vst.msk [vmem:[#allocation0] sm:$0x3] %vm32_vm4, %v31_v19  }
  0x7c   :  { %v38_v20 = vpop.permute.xlu0 %37  }
  0x7d   :  { %40 = vst.msk [vmem:[#allocation0] sm:$0x3] %vm39_vm5, %v38_v20   ;;  %v45_v21 = vpop.permute.xlu1 %44  }
  0x7e   :  { %47 = vst.msk [vmem:[#allocation0] sm:$0x3] %vm46_vm6, %v45_v21  }
  0x80   :  { %v52_v22 = vpop.permute.xlu0 %51  }
  0x81   :  { %54 = vst.msk [vmem:[#allocation0] sm:$0x3] %vm53_vm7, %v52_v22   ;;  %v59_v23 = vpop.permute.xlu1 %58  }
  0x82   :  { %61 = vst.msk [vmem:[#allocation0] sm:$0x3] %vm60_vm8, %v59_v23  }
  0x84   :  { %v66_v24 = vpop.permute.xlu0 %65  }
  0x85   :  { %68 = vst.msk [vmem:[#allocation0] sm:$0x3] %vm67_vm9, %v66_v24   ;;  %v73_v25 = vpop.permute.xlu1 %72  }
  0x86   :  { %75 = vst.msk [vmem:[#allocation0] sm:$0x3] %vm74_vm10, %v73_v25  }
  0x88   :  { %v80_v26 = vpop.permute.xlu0 %79  }
  0x89   :  { %82 = vst.msk [vmem:[#allocation0] sm:$0x3] %vm81_vm11, %v80_v26   ;;  %v87_v27 = vpop.permute.xlu1 %86  }
  0x8a   :  { %89 = vst.msk [vmem:[#allocation0] sm:$0x3] %vm88_vm12, %v87_v27  }
  0x8c   :  { %v94_v28 = vpop.permute.xlu0 %93  }
  0x8d   :  { %96 = vst.msk [vmem:[#allocation0] sm:$0x3] %vm95_vm13, %v94_v28   ;;  %v101_v29 = vpop.permute.xlu1 %100  }
  0x8e   :  { %103 = vst.msk [vmem:[#allocation0] sm:$0x3] %vm102_vm14, %v101_v29  }
  0x90   :  { %v108_v30 = vpop.permute.xlu0 %107  }
  0x91   :  { %110 = vst.msk [vmem:[#allocation0] sm:$0x3] %vm109_vm15, %v108_v30  }
  0x98   :  { %v115_v31 = vld [vmem:[#allocation0] sm:$0x3] }
  0x99   :  { %118 = vst [vmem:[%s226_s1] sm:$0x3] %v115_v31 }

// kernel: _decoder_heads.1
= control target key start
LH: loop header
LB: loop body
LE: loop exit
PB: predicated region body
PF: predicated region fallthrough
CT: control target
= control target key end

     0   :  { %v548_v1 = vmov 0.0   ;;  %vm549_vm0 = vmmov 0   ;;  %s723_s0 = inlined_call_operand.vmem [shape: f32[8,32], index: 0, kind: input, shape index: {}]   ;;  %s724_s1 = inlined_call_operand.vmem [shape: f32[8,8], index: 1, kind: input, shape index: {}]   ;;  %s725_s2 = inlined_call_operand.vmem [shape: f32[32,32], index: 2, kind: input, shape index: {}]   ;;  %s726_s3 = inlined_call_operand.vmem [shape: f32[1,32], index: 3, kind: input, shape index: {}]   ;;  %s727_s4 = inlined_call_operand.vmem [shape: f32[1,32], index: 4, kind: input, shape index: {}]   ;;  %s728_s5 = inlined_call_operand.vmem [shape: f32[1,32], index: 5, kind: input, shape index: {}]   ;;  %s729_s6 = inlined_call_operand.vmem [shape: f32[32,32], index: 6, kind: input, shape index: {}]   ;;  %s730_s7 = inlined_call_operand.vmem [shape: f32[1,32], index: 7, kind: input, shape index: {}]   ;;  %s731_s8 = inlined_call_operand.vmem [shape: f32[1,32], index: 8, kind: input, shape index: {}]   ;;  %s732_s9 = inlined_call_operand.vmem [shape: f32[1,32], index: 9, kind: input, shape index: {}]   ;;  %s733_s10 = inlined_call_operand.vmem [shape: f32[32,32], index: 10, kind: input, shape index: {}]   ;;  %s734_s11 = inlined_call_operand.vmem [shape: f32[1,32], index: 11, kind: input, shape index: {}]   ;;  %s735_s12 = inlined_call_operand.vmem [shape: f32[8,32], index: 12, kind: input, shape index: {}]   ;;  %s736_s13 = inlined_call_operand.hbm [shape: f32[8,32], index: 13, kind: output, shape index: {}]  }
   0x1   :  { %v49_v0 = vld [vmem:[%s725_s2 + $0x18] sm:$0xff]  ;;  %481 = vmatprep.subr.mxu0 %v548_v1  ;;  %v48_v2 = vld [vmem:[%s725_s2 + $0x10] sm:$0xff]  ;;  %489 = vmatprep.mubr.msk.f32.mxu0 %vm549_vm0, %v548_v1 }
   0x2   :  { %482 = vmatpush3.msra.mxu0 %v49_v0  ;;  %492 = vmatprep.subr.mxu1 %v548_v1 }
   0x3   :  { %18 = vsyncpa [#allocation3], 0  ;;  %483 = vmatprep.subr.mxu0 %v548_v1  ;;  %v47_v3 = vld [vmem:[%s725_s2 + $0x8] sm:$0xff]  ;;  %500 = vmatprep.mubr.msk.f32.mxu1 %vm549_vm0, %v548_v1  ;;  %v46_v4 = vld [vmem:[%s725_s2] sm:$0xff]  ;;  %vm57_vm1 = vcmask 261120   ;;  %vm283_vm2 = vcmask 64512  }
   0x4   :  { %484 = vmatpush3.msra.mxu0 %v48_v2  ;;  %v644_v5 = vld [vmem:[%s723_s0] sm:$0xff]  ;;  %v165_v16 = vld [vmem:[%s729_s6 + $0x18] sm:$0xff]  ;;  %v164_v17 = vld [vmem:[%s729_s6 + $0x10] sm:$0xff] }
   0x5   :  { %485 = vmatprep.subr.mxu0 %v548_v1  ;;  %v453_v6 = vld [vmem:[%s726_s3] ss:$0 sm:$0xff]  ;;  %493 = vmatpush3.msra.mxu1 %v165_v16  ;;  %v163_v18 = vld [vmem:[%s729_s6 + $0x8] sm:$0xff]  ;;  %v280_v40 = vld [vmem:[%s733_s10 + $0x18] sm:$0xff] }
   0x6   :  { %486 = vmatpush3.msra.mxu0 %v47_v3  ;;  %494 = vmatprep.subr.mxu1 %v548_v1  ;;  %v162_v19 = vld [vmem:[%s729_s6] sm:$0xff]  ;;  %v279_v41 = vld [vmem:[%s733_s10 + $0x10] sm:$0xff]  ;;  %v278_v44 = vld [vmem:[%s733_s10 + $0x8] sm:$0xff] }
   0x7   :  { %487 = vmatprep.subr.mxu0 %v548_v1  ;;  %495 = vmatpush3.msra.mxu1 %v164_v17  ;;  %v455_v24 = vld [vmem:[%s727_s4] ss:$0 sm:$0xff] }
   0x8   :  { %488 = vmatpush3.msra.mxu0 %v46_v4  ;;  %496 = vmatprep.subr.mxu1 %v548_v1  ;;  %v456_v26 = vld [vmem:[%s728_s5] ss:$0 sm:$0xff] }
   0x9   :  { %490 = vmatmul.mubr.msk.f32.vlgmr.msra.gmra.mxu0 %vm57_vm1, %v644_v5  ;;  %503 = vmatprep.subr.mxu0 %v548_v1  ;;  %v457_v30 = vld [vmem:[%s730_s7] ss:$0 sm:$0xff] }
   0xa   :  { %505 = vmatprep.mubr.msk.f32.mxu0 %vm549_vm0, %v548_v1  ;;  %497 = vmatpush3.msra.mxu1 %v163_v18  ;;  %v282_v42 = vld [vmem:[%s735_s12] sm:$0xff] }
   0xb   :  { %498 = vmatprep.subr.mxu1 %v548_v1  ;;  %504 = vmatpush3.msra.mxu0 %v282_v42  ;;  %v281_v43 = vld [vmem:[%s724_s1] sm:$0xff] }
   0xc   :  { %499 = vmatpush3.msra.mxu1 %v162_v19  ;;  %v277_v45 = vld [vmem:[%s733_s10] sm:$0xff] }
   0xd   :  { %508 = vmatprep.subr.mxu1 %v548_v1  ;;  %506 = vmatmul.mubr.msk.f32.vlgmr.msra.gmra.mxu0 %vm283_vm2, %v281_v43  ;;  %v459_v50 = vld [vmem:[%s731_s8] ss:$0 sm:$0xff]  ;;  %s550_s8 = smov [#allocation2]  }
   0xe   :  { %v460_v52 = vld [vmem:[%s732_s9] ss:$0 sm:$0xff]  ;;  %s445_s22 = sshll.u32 %s550_s8, 4  ;;  %s446_s22 = int_to_ptr.vmem [resolvable:$true] %s445_s22 }
   0xf   :  { %v463_v60 = vld [vmem:[%s734_s11] ss:$0 sm:$0xff]  ;;  %s526_s9 = scalar_lea.vmem %s446_s22, 128  ;;  %p531_p1 = scmp.lt.s32.totalorder %s446_s22, %s446_s22 }
  0x10   :  { %p527_p0 = scmp.ne.s32.totalorder %s446_s22, %s526_s9  ;;  %p532_p2 = scmp.lt.s32.totalorder %s526_s9, %s526_s9 }
  0x12   :  { %p533_p3 = por %p532_p2, %p531_p1 }
  0x14   :  { %p534_p4 = pnand %p533_p3, %p527_p0 }
  0xc9   :  { %v127_v7 = vpop.f32.mrf.mxu0 }
  0xca   :  { %v128_v8 = vadd.f32 %v453_v6, %v127_v7 }
  0xcb   :  { %v491_v9 = vpop.f32.mrf.mxu0 }
  0xcc   :  { %v131_v10 = vsel %vm57_vm1, %v128_v8, 0.0 }
  0xcd   :  { %132 = vadd.xlane.f32.xlu0 %v131_v10  ;;  %v353_v57 = vpop.f32.mrf.mxu0 }
  0xcf   :  { %v507_v58 = vpop.f32.mrf.mxu0 }
 0x156   :  { %v133_v11 = vpop.xlane.xlu0 %132 }
 0x157   :  { %v135_v12 = vmul.f32 0.03125, %v133_v11 }
 0x159   :  { %v136_v13 = vsub.f32 %v128_v8, %v135_v12 }
 0x15b   :  { %v137_v14 = vmul.f32 %v136_v13, %v136_v13 }
 0x15d   :  { %v138_v15 = vsel %vm57_vm1, %v137_v14, 0.0 }
 0x15e   :  { %139 = vadd.xlane.f32.xlu0 %v138_v15 }
 0x1e7   :  { %v140_v20 = vpop.xlane.xlu0 %139 }
 0x1e8   :  { %v141_v21 = vmul.f32 0.03125, %v140_v20 }
 0x1ea   :  { %v142_v22 = vadd.f32 1e-05, %v141_v21 }
 0x1ec   :  { %522 = vrsqrt.f32 %v142_v22 }
 0x1f9   :  { %v523_v23 = vpop.eup %522 }
 0x1fa   :  { %v144_v25 = vmul.f32 %v523_v23, %v136_v13 }
 0x1fc   :  { %v152_v27 = vmul.f32 %v455_v24, %v144_v25 }
 0x1fe   :  { %v160_v28 = vadd.f32 %v456_v26, %v152_v27 }
 0x200   :  { %v161_v29 = vmax.f32 %v160_v28, 0.0 }
 0x202   :  { %501 = vmatmul.mubr.msk.f32.vlgmr.msra.gmra.mxu1 %vm57_vm1, %v161_v29 }
 0x203   :  { %516 = vmatprep.mubr.msk.f32.mxu1 %vm549_vm0, %v548_v1  ;;  %509 = vmatpush3.msra.mxu1 %v280_v40 }
 0x204   :  { %510 = vmatprep.subr.mxu1 %v548_v1 }
 0x205   :  { %511 = vmatpush3.msra.mxu1 %v279_v41 }
 0x206   :  { %512 = vmatprep.subr.mxu1 %v548_v1 }
 0x207   :  { %513 = vmatpush3.msra.mxu1 %v278_v44 }
 0x208   :  { %514 = vmatprep.subr.mxu1 %v548_v1 }
 0x209   :  { %515 = vmatpush3.msra.mxu1 %v277_v45 }
 0x2c2   :  { %v242_v31 = vpop.f32.mrf.mxu1 }
 0x2c3   :  { %v243_v32 = vadd.f32 %v457_v30, %v242_v31 }
 0x2c4   :  { %v502_v33 = vpop.f32.mrf.mxu1 }
 0x2c5   :  { %v246_v34 = vsel %vm57_vm1, %v243_v32, 0.0 }
 0x2c6   :  { %247 = vadd.xlane.f32.xlu1 %v246_v34 }
 0x34f   :  { %v248_v35 = vpop.xlane.xlu1 %247 }
 0x350   :  { %v249_v36 = vmul.f32 0.03125, %v248_v35 }
 0x352   :  { %v250_v37 = vsub.f32 %v243_v32, %v249_v36 }
 0x354   :  { %v251_v38 = vmul.f32 %v250_v37, %v250_v37 }
 0x356   :  { %v252_v39 = vsel %vm57_vm1, %v251_v38, 0.0 }
 0x357   :  { %253 = vadd.xlane.f32.xlu1 %v252_v39 }
 0x3e0   :  { %v254_v46 = vpop.xlane.xlu1 %253 }
 0x3e1   :  { %v255_v47 = vmul.f32 0.03125, %v254_v46 }
 0x3e3   :  { %v256_v48 = vadd.f32 1e-05, %v255_v47 }
 0x3e5   :  { %524 = vrsqrt.f32 %v256_v48 }
 0x3f2   :  { %v525_v49 = vpop.eup %524 }
 0x3f3   :  { %v258_v51 = vmul.f32 %v525_v49, %v250_v37 }
 0x3f5   :  { %v266_v53 = vmul.f32 %v459_v50, %v258_v51 }
 0x3f7   :  { %v274_v54 = vadd.f32 %v460_v52, %v266_v53 }
 0x3f9   :  { %v275_v55 = vadd.f32 %v274_v54, %v644_v5 }
 0x3fb   :  { %v276_v56 = vmax.f32 %v275_v55, 0.0 }
 0x3fd   :  { %517 = vmatmul.mubr.msk.f32.vlgmr.msra.gmra.mxu1 %vm57_vm1, %v276_v56 }
 0x4bd   :  { %v426_v59 = vpop.f32.mrf.mxu1 }
 0x4be   :  { %v427_v61 = vadd.f32 %v426_v59, %v353_v57 }
 0x4bf   :  { %v518_v62 = vpop.f32.mrf.mxu1 }
 0x4c0   :  { %v437_v63 = vadd.f32 %v463_v60, %v427_v61 }
 0x4c2   :  { %438 = vst.msk [vmem:[#allocation2] sm:$0xff] %vm57_vm1, %v437_v63 }
 0x4c3   :  { %537 = shalt.err (!%p534_p4)
}
 0x4c4   :  { %448 = dma.vmem_to_hbm [thread:$0]  %s446_s22, 128, %s736_s13, [#allocation3]  }
 0x4c5   :  { %546 = dma.done.wait [#allocation3], 128  }
 0x4c6   :  { %547 = vsyncadd [#allocation3], 4294967168 }
 0x4c7   :  { %452 = vsyncpa [#allocation3], 1 }

</bundles_post_ra>
